<compile_context>
chip_gen: v5e
topology: v5e:2x2
jax: 0.10.0
libtpu: 0.0.40
codegen_flags: <defaults>
</compile_context>

<pallas_src>
import itertools

import numpy as np
import jax
import jax.numpy as jnp
from jax.experimental import pallas as pl
from jax.experimental.pallas import tpu as pltpu

_PACK = 2                 # 8x8 blocks packed per kernel row -> 128-lane-dense rows
_ROW_WIDTH = _PACK * 64   # 128
_DEFAULT_TILE = 4096      # rows per grid step (f32: 2 MiB in + 2 MiB out per buffer)
_MIN_GRID_STEPS = 4       # keep several grid steps so the parallel row axis can shard over TCs


def _round_up(x: int, m: int) -> int:
    return ((x + m - 1) // m) * m


def _make_alpha_tensor():
    """Deterministic parameters, exactly as in _DeDCT8x8.__init__."""
    alpha_1d = np.array([1.0 / np.sqrt(2)] + [1.0] * 7)
    alpha = np.outer(alpha_1d, alpha_1d).astype(np.float32)            # (8, 8)
    tensor = np.zeros((8, 8, 8, 8), dtype=np.float32)
    for i, j, u, v in itertools.product(range(8), repeat=4):
        tensor[i, j, u, v] = (np.cos((2 * u + 1) * i * np.pi / 16)
                              * np.cos((2 * v + 1) * j * np.pi / 16))
    return alpha, tensor


def _make_packed_basis() -> jax.Array:
    """0.25 * diag(alpha_flat) @ T_flat, replicated block-diagonally for packed rows."""
    alpha, tensor = _make_alpha_tensor()
    t_flat = tensor.reshape(64, 64)
    # (x * alpha) @ T == x @ (diag(alpha_flat) @ T); fold the 0.25 too.
    t_eff = (0.25 * alpha.reshape(64, 1) * t_flat).astype(np.float32)  # (64, 64)
    t_packed = np.kron(np.eye(_PACK, dtype=np.float32), t_eff)         # (128, 128)
    return jnp.asarray(t_packed)


def _dedct_kernel(x_ref, t_ref, o_ref):
    # x_ref: (TILE, 128) two packed 8x8 blocks per row, native input dtype
    # t_ref: (128, 128)  block-diagonal folded basis (resident across grid steps)
    # o_ref: (TILE, 128) f32
    x = x_ref[...].astype(jnp.float32)   # in-kernel cast: keeps HBM traffic narrow
    o_ref[...] = jnp.dot(x, t_ref[...], preferred_element_type=jnp.float32) + 128.0


def _choose_tile(n_rows: int, tile: int) -> int:
    if n_rows <= 8 * _MIN_GRID_STEPS:
        # Tiny input: single block equal to the full array (always a legal block shape).
        return n_rows
    # Keep at least _MIN_GRID_STEPS grid steps; 32-row alignment covers f32..int8 tiling.
    t = min(tile, _round_up(pl.cdiv(n_rows, _MIN_GRID_STEPS), 32))
    return max(t, 32)


def dedct8x8(x: jax.Array, *, tile: int = _DEFAULT_TILE) -> jax.Array:
    """x: (..., 8, 8) -> (..., 8, 8) float32 (inverse 8x8 DCT + 128 offset)."""
    t_packed = _make_packed_basis()

    lead_shape = x.shape[:-2]
    n = int(np.prod(lead_shape)) if lead_shape else 1
    x_flat = x.reshape(n, 64)                       # native dtype, no host upcast

    # Pack _PACK blocks per 128-wide row (pad one block only if n is odd).
    n_rows = -(-n // _PACK)                         # ceil(n / _PACK)
    pad_blocks = n_rows * _PACK - n
    if pad_blocks:
        x_flat = jnp.pad(x_flat, ((0, pad_blocks), (0, 0)))
    x_packed = x_flat.reshape(n_rows, _ROW_WIDTH)   # contiguous reshape: free view

    tile = _choose_tile(n_rows, tile)
    grid = (pl.cdiv(n_rows, tile),)                 # ragged last block handled by Pallas

    itemsize = jnp.dtype(x_packed.dtype).itemsize
    cost = pl.CostEstimate(
        flops=2 * n_rows * _ROW_WIDTH * _ROW_WIDTH,
        transcendentals=0,
        bytes_accessed=(n_rows * _ROW_WIDTH * itemsize          # input (native dtype)
                        + n_rows * _ROW_WIDTH * 4                # f32 output
                        + _ROW_WIDTH * _ROW_WIDTH * 4),          # resident basis
    )

    out_packed = pl.pallas_call(
        _dedct_kernel,
        out_shape=jax.ShapeDtypeStruct((n_rows, _ROW_WIDTH), jnp.float32),
        grid=grid,
        in_specs=[
            pl.BlockSpec((tile, _ROW_WIDTH), lambda i: (i, 0)),        # streamed rows
            pl.BlockSpec((_ROW_WIDTH, _ROW_WIDTH), lambda i: (0, 0)),  # resident basis
        ],
        out_specs=pl.BlockSpec((tile, _ROW_WIDTH), lambda i: (i, 0)),
        compiler_params=pltpu.CompilerParams(
            dimension_semantics=("parallel",),
        ),
        cost_estimate=cost,
    )(x_packed, t_packed)

    out_flat = out_packed.reshape(n_rows * _PACK, 64)
    if pad_blocks:                                   # only slice when we actually padded
        out_flat = out_flat[:n]
    return out_flat.reshape(*lead_shape, 8, 8)


def _reference(x: jax.Array) -> jax.Array:
    """Pure-JAX reference mirroring the PyTorch forward."""
    alpha, tensor = _make_alpha_tensor()
    xa = x.astype(jnp.float32) * jnp.asarray(alpha)
    return 0.25 * jnp.tensordot(xa, jnp.asarray(tensor), axes=2) + 128.0


if __name__ == "__main__":
    key = jax.random.PRNGKey(0)
    # Small shape consistent with the module: batch=2, channels=4, 8x8 DCT blocks.
    x = jax.random.normal(key, (2, 4, 8, 8), dtype=jnp.float32)

    out = jax.block_until_ready(dedct8x8(x))
    ref = _reference(x)
    np.testing.assert_allclose(np.asarray(out), np.asarray(ref), rtol=1e-5, atol=1e-4)
    assert out.shape == x.shape and out.dtype == jnp.float32

    # Exercise the odd-block-count / ragged-grid paths with a slightly larger batch.
    x_big = jax.random.normal(jax.random.PRNGKey(1), (3, 5, 7, 8, 8), jnp.float32)
    out_big = jax.block_until_ready(dedct8x8(x_big))
    np.testing.assert_allclose(np.asarray(out_big), np.asarray(_reference(x_big)),
                               rtol=1e-5, atol=1e-4)

    print("KERNEL_OK")
</pallas_src>

<mosaic_0001>
module attributes {stable_mosaic.version = 11 : i64} {
  func.func @_dedct_kernel(%arg0: i32, %arg1: memref<4x128xf32, #tpu.memory_space<vmem>>, %arg2: memref<128x128xf32, #tpu.memory_space<vmem>>, %arg3: memref<4x128xf32, #tpu.memory_space<vmem>>) attributes {dimension_semantics = [#tpu.dimension_semantics<parallel>], iteration_bounds = array<i64: 1>, scalar_prefetch = 0 : i64, scratch_operands = 0 : i64, tpu.core_type = #tpu.core_type<tc>, window_params = [{transform_indices = @transform_0, window_bounds = array<i64: 4, 128>}, {pipeline_mode = #tpu.pipeline_mode<synchronous>, transform_indices = @transform_1, window_bounds = array<i64: 128, 128>}, {transform_indices = @transform_2, window_bounds = array<i64: 4, 128>}]} {
    %c0 = arith.constant 0 : index
    %c0_0 = arith.constant 0 : index
    %0 = vector.load %arg1[%c0, %c0_0] : memref<4x128xf32, #tpu.memory_space<vmem>>, vector<4x128xf32>
    %c0_1 = arith.constant 0 : index
    %c0_2 = arith.constant 0 : index
    %1 = vector.load %arg2[%c0_1, %c0_2] : memref<128x128xf32, #tpu.memory_space<vmem>>, vector<128x128xf32>
    %cst = arith.constant dense<0.000000e+00> : vector<4x128xf32>
    %2 = tpu.matmul %0, %1, %cst {dimension_numbers = #tpu.dot_dimension_numbers<[1], [0], [0], [1], [0, 0, 1, 1], [], []>} : vector<4x128xf32>, vector<128x128xf32>, vector<4x128xf32> -> vector<4x128xf32>
    %cst_3 = arith.constant 1.280000e+02 : f32
    %3 = vector.broadcast %cst_3 : f32 to vector<4x128xf32>
    %4 = arith.addf %2, %3 : vector<4x128xf32>
    %c0_4 = arith.constant 0 : index
    %c0_5 = arith.constant 0 : index
    %5 = vector.load %arg3[%c0_4, %c0_5] : memref<4x128xf32, #tpu.memory_space<vmem>>, vector<4x128xf32>
    tpu.vector_store %arg3[%c0_4, %c0_5], %4 {strides = array<i32>} : memref<4x128xf32, #tpu.memory_space<vmem>>, vector<4x128xf32>,
    return
  }
  func.func @transform_0(%arg0: i32) -> (i32, i32) {
    %c0_i32 = arith.constant 0 : i32
    %c0_i32_0 = arith.constant 0 : i32
    return %arg0, %c0_i32 : i32, i32
  }
  func.func @transform_1(%arg0: i32) -> (i32, i32) {
    %c0_i32 = arith.constant 0 : i32
    %c0_i32_0 = arith.constant 0 : i32
    %c0_i32_1 = arith.constant 0 : i32
    return %c0_i32, %c0_i32_0 : i32, i32
  }
  func.func @transform_2(%arg0: i32) -> (i32, i32) {
    %c0_i32 = arith.constant 0 : i32
    %c0_i32_0 = arith.constant 0 : i32
    return %arg0, %c0_i32 : i32, i32
  }
}

</mosaic_0001>

<bundles_post_ra>
// kernel: tpu_custom_call.1
= control target key start
LH: loop header
LB: loop body
LE: loop exit
PB: predicated region body
PF: predicated region fallthrough
CT: control target
= control target key end

     0   :  { %7 = vsyncpa [#allocation3], 0  ;;  %s210_s0 = inlined_call_operand.hbm [shape: f32[4,128], index: 0, kind: input, shape index: {}]   ;;  %s211_s1 = inlined_call_operand.hbm [shape: f32[128,128], index: 1, kind: input, shape index: {}]   ;;  %s212_s2 = inlined_call_operand.hbm [shape: f32[4,128], index: 2, kind: output, shape index: {}]  }
   0x1   :  { %8 = vsyncpa [#allocation6], 0 }
   0x2   :  { %9 = vsyncpa [#allocation4], 0  ;;  %s15_s11 = sshll.u32 %s210_s0, 4  ;;  %s181_s12 = smov [#allocation2]   ;;  %s16_s11 = int_to_ptr.hbm [resolvable:$true] %s15_s11 }
   0x3   :  { %s17_s13 = sshll.u32 %s181_s12, 4  ;;  %s25_s16 = sshll.u32 %s211_s1, 4  ;;  %s18_s13 = int_to_ptr.vmem [resolvable:$true] %s17_s13  ;;  %s26_s16 = int_to_ptr.hbm [resolvable:$true] %s25_s16 }
   0x4   :  { %20 = dma.hbm_to_vmem [thread:$0]  %s16_s11, 64, %s18_s13, [#allocation3]  }
   0x5   :  { %s182_s17 = smov [#allocation5]   ;;  %s183_s19 = smov 128  }
   0x6   :  { %s27_s18 = sshll.u32 %s182_s17, 4  ;;  %s184_s20 = smov 8   ;;  %s28_s18 = int_to_ptr.vmem [resolvable:$true] %s27_s18 }
   0x7   :  { %33 = dma.hbm_to_vmem [thread:$0]  %s26_s16, 2048, %s28_s18, [#allocation6], %s183_s19, %s183_s19, %s184_s20  }
   0x8   :  { %175 = dma.done.wait [#allocation3], 64  }
   0x9   :  { %176 = vsyncadd [#allocation3], 4294967232 }
   0xa   :  { %177 = dma.done.wait [#allocation6], 2048  }
   0xb   :  { %178 = vsyncadd [#allocation6], 4294965248  ;;  %v58_v0 = vld [vmem:[#allocation5 + $0x78] sm:$0xff]  ;;  %v57_v1 = vld [vmem:[#allocation5 + $0x70] sm:$0xff]  ;;  %s185_s0 = smov [#allocation7]   ;;  %s87_s23 = sshll.u32 %s212_s2, 4  ;;  %s88_s23 = int_to_ptr.hbm [resolvable:$true] %s87_s23 }
   0xc   :  { %59 = vmatpush.msra.mxu0 %v58_v0  ;;  %v56_v2 = vld [vmem:[#allocation5 + $0x68] sm:$0xff]  ;;  %v55_v3 = vld [vmem:[#allocation5 + $0x60] sm:$0xff]  ;;  %v54_v4 = vld [vmem:[#allocation5 + $0x58] sm:$0xff]  ;;  %s85_s1 = sshll.u32 %s185_s0, 4  ;;  %s86_s1 = int_to_ptr.vmem [resolvable:$true] %s85_s1 }
   0xd   :  { %v53_v5 = vld [vmem:[#allocation5 + $0x50] sm:$0xff]  ;;  %v52_v6 = vld [vmem:[#allocation5 + $0x48] sm:$0xff]  ;;  %v51_v7 = vld [vmem:[#allocation5 + $0x40] sm:$0xff] }
   0xe   :  { %60 = vmatpush.msra.mxu0 %v57_v1  ;;  %v50_v8 = vld [vmem:[#allocation5 + $0x38] sm:$0xff]  ;;  %v49_v9 = vld [vmem:[#allocation5 + $0x30] sm:$0xff]  ;;  %v48_v10 = vld [vmem:[#allocation5 + $0x28] sm:$0xff] }
   0xf   :  { %v47_v11 = vld [vmem:[#allocation5 + $0x20] sm:$0xff]  ;;  %v46_v12 = vld [vmem:[#allocation5 + $0x18] sm:$0xff]  ;;  %v45_v13 = vld [vmem:[#allocation5 + $0x10] sm:$0xff] }
  0x10   :  { %61 = vmatpush.msra.mxu0 %v56_v2  ;;  %v44_v14 = vld [vmem:[#allocation5 + $0x8] sm:$0xff]  ;;  %v43_v15 = vld [vmem:[#allocation5] sm:$0xff]  ;;  %v42_v16 = vld [vmem:[#allocation2] sm:$0xf] }
  0x12   :  { %62 = vmatpush.msra.mxu0 %v55_v3 }
  0x14   :  { %63 = vmatpush.msra.mxu0 %v54_v4 }
  0x16   :  { %64 = vmatpush.msra.mxu0 %v53_v5 }
  0x18   :  { %65 = vmatpush.msra.mxu0 %v52_v6 }
  0x1a   :  { %66 = vmatpush.msra.mxu0 %v51_v7 }
  0x1c   :  { %67 = vmatpush.msra.mxu0 %v50_v8 }
  0x1e   :  { %68 = vmatpush.msra.mxu0 %v49_v9 }
  0x20   :  { %69 = vmatpush.msra.mxu0 %v48_v10 }
  0x22   :  { %70 = vmatpush.msra.mxu0 %v47_v11 }
  0x24   :  { %71 = vmatpush.msra.mxu0 %v46_v12 }
  0x26   :  { %72 = vmatpush.msra.mxu0 %v45_v13 }
  0x28   :  { %73 = vmatpush.msra.mxu0 %v44_v14 }
  0x2a   :  { %74 = vmatpush.msra.mxu0 %v43_v15 }
  0x2b   :  { %75 = vmatmul.f32.vlgmr.msra.gmra.mxu0 %v42_v16 }
  0xa8   :  { %v76_v17 = vpop.f32.mrf.mxu0 }
  0xa9   :  { %v77_v18 = vadd.f32 128.0, %v76_v17 }
  0xab   :  { %79 = vst [vmem:[#allocation7] sm:$0xf] %v77_v18 }
  0xac   :  { %90 = dma.vmem_to_hbm [thread:$0]  %s86_s1, 64, %s88_s23, [#allocation4]  }
  0xad   :  { %179 = dma.done.wait [#allocation4], 64  }
  0xae   :  { %180 = vsyncadd [#allocation4], 4294967232 }
  0xaf   :  { %95 = vsyncpa [#allocation3], 1 }
  0xb0   :  { %96 = vsyncpa [#allocation6], 1 }
  0xb1   :  { %97 = vsyncpa [#allocation4], 1 }

</bundles_post_ra>
